<compile_context>
chip_gen: v6e
topology: v6e:2x2x1
jax: 0.10.0
libtpu: 0.0.40
codegen_flags: <defaults>
</compile_context>

<pallas_src>
import functools

import jax
import jax.numpy as jnp
from jax.experimental import pallas as pl
from jax.experimental.pallas import tpu as pltpu


def _conv_bn_relu_kernel(x_ref, w_ref, o_ref, patches_ref, *, H, W, KH, KW, pad, bn):
    """One grid step: `bn` images, full spatial extent, all channels.

    x_ref:       (bn, C, H*W)  NCHW activations, spatial flattened on the lane axis
    w_ref:       (O, Kp)       BN-folded conv weights; column t*C+c = w[o,c,ky,kx]*scale[o],
                               column KH*KW*C = BN bias, remaining columns zero
    o_ref:       (bn, O, H*W)  output, lane-dense store
    patches_ref: (Kp, H*W)     VMEM im2col scratch (Kp = KH*KW*C+1 rounded up to 128)
    """
    HW = H * W
    C = x_ref.shape[1]
    K2C = KH * KW * C

    # Zero the scratch so the padded contraction rows (K2C+1..Kp) contribute exactly 0
    # to the MXU matmul (stale VMEM could otherwise be NaN/Inf), then write the
    # all-ones row that the folded-bias weight column multiplies against.
    patches_ref[...] = jnp.zeros_like(patches_ref)
    patches_ref[K2C:K2C + 1, :] = jnp.ones((1, HW), jnp.float32)

    # Per-tap zero-padding masks from iota comparisons (no DMA'd mask input), hoisted
    # out of the batch loop (JAX does not CSE broadcast_in_dim).
    p = jax.lax.broadcasted_iota(jnp.int32, (1, HW), 1)
    if W & (W - 1) == 0:                       # power-of-two width: pure bit ops
        ys = p >> (W.bit_length() - 1)
        xs = p & (W - 1)
    else:                                      # general width
        ys = p // W
        xs = p - ys * W
    taps = []
    for ky in range(KH):
        for kx in range(KW):
            dy, dx = ky - pad, kx - pad
            t = ky * KW + kx
            s = dy * W + dx                    # flattened spatial shift of this tap
            if dy == 0 and dx == 0:
                taps.append((t, s, None))      # center tap: mask is all-ones
            else:
                valid = ((ys + dy >= 0) & (ys + dy < H) &
                         (xs + dx >= 0) & (xs + dx < W))
                mask = jnp.broadcast_to(valid.astype(jnp.float32), (C, HW))
                taps.append((t, s, mask))

    w = w_ref[...]                             # (O, Kp): tiny, load once into vregs

    def process(n):
        x_n = x_ref[n]                         # (C, HW), lanes = flattened spatial
        for t, s, mask in taps:
            # Lane rotation on the XLU; wrapped / out-of-bounds lanes are zeroed by the
            # mask, which implements the conv zero padding.
            shifted = x_n if s == 0 else pltpu.roll(x_n, (-s) % HW, axis=1)
            tap = shifted if mask is None else shifted * mask
            patches_ref[t * C:(t + 1) * C, :] = tap
        # One f32 MXU matmul per image; BN scale/bias are already folded into `w`,
        # so the epilogue is just the ReLU followed by a lane-dense store.
        acc = jnp.dot(w, patches_ref[...],
                      preferred_element_type=jnp.float32,
                      precision=jax.lax.Precision.HIGHEST)
        o_ref[n] = jnp.maximum(acc, 0.0).astype(o_ref.dtype)

    if bn <= 8:
        for n in range(bn):                    # small static trip count: unroll
            process(n)
    else:
        # Larger batch blocks: keep code size / vreg live ranges bounded.
        jax.lax.fori_loop(0, bn, lambda n, c: (process(n), c)[1], 0)


def conv_block(x_nchw, weight_oihw, gamma, beta, running_mean, running_var,
               *, stride=1, padding=1, eps=1e-3, batch_block=None):
    """ConvBlock forward: Conv2d(k, s=1, p, bias=False) + BatchNorm2d(eps) + ReLU."""
    # TODO(synk): training-mode BatchNorm (batch statistics + running-stat update) is not
    # implemented; the kernel folds the running statistics (eval-mode semantics).
    N, C, H, W = x_nchw.shape
    O, Ci, KH, KW = weight_oihw.shape
    assert Ci == C, "channel mismatch"
    assert stride == 1, "kernel implements stride-1 convolution only"
    Ho = H + 2 * padding - KH + 1
    Wo = W + 2 * padding - KW + 1
    assert (Ho, Wo) == (H, W), "kernel requires 'same' conv (p == (k-1)//2, s == 1)"

    HW = H * W
    # The roll+mask scheme needs the whole flattened image on the lane axis of a single
    # block.  TODO(synk): for larger images, tile H with a halo row top/bottom (keeping
    # the last block dim a multiple of 128) instead of flattening all of H*W.
    assert max(C, O) * HW * 4 <= 4 * 1024 * 1024, \
        "image too large for the single-block roll+mask conv; tile H with a halo"

    if batch_block is None:
        # >= 2 grid steps on the "parallel" batch axis keeps both v7x TensorCores busy
        # (no effect on single-TC v5e/v6e beyond ~0.35us per extra step).
        batch_block = N // 2 if (N >= 2 and N % 2 == 0) else N
    assert N % batch_block == 0

    K2C = KH * KW * C
    Kp = ((K2C + 1 + 127) // 128) * 128        # 128-aligned contraction dim for the MXU

    # Free reshape only: activations stay NCHW; no transpose / pad HBM passes.
    x_flat = x_nchw.reshape(N, C, HW).astype(jnp.float32)

    # Fold BatchNorm (eval mode) into the weights (scale) and one extra column (bias):
    #   w_packed[o, t*C+c] = w[o,c,ky,kx] * gamma[o]/sqrt(var[o]+eps)
    #   w_packed[o, K2C]   = beta[o] - mean[o] * gamma[o]/sqrt(var[o]+eps)
    inv_std = 1.0 / jnp.sqrt(running_var.astype(jnp.float32) + eps)
    scale = gamma.astype(jnp.float32) * inv_std                    # (O,)
    bias = beta.astype(jnp.float32) - running_mean.astype(jnp.float32) * scale
    w2 = jnp.transpose(weight_oihw, (0, 2, 3, 1)).reshape(O, K2C).astype(jnp.float32)
    w_packed = jnp.zeros((O, Kp), jnp.float32)
    w_packed = w_packed.at[:, :K2C].set(w2 * scale[:, None]).at[:, K2C].set(bias)

    # VMEM budget: double-buffered in/out blocks + weights + the im2col scratch.
    vmem_bytes = (2 * 4 * batch_block * (C + O) * HW
                  + 2 * 4 * O * Kp
                  + 4 * Kp * HW)
    assert vmem_bytes <= 48 * 1024 * 1024, \
        "block too large for v7x's 64 MiB VMEM; lower batch_block or tile H"
    vmem_limit = None
    if vmem_bytes > 12 * 1024 * 1024:          # would crowd v5e's 16 MiB default scope
        vmem_limit = min(2 * vmem_bytes, 60 * 1024 * 1024)

    kernel = functools.partial(_conv_bn_relu_kernel, H=H, W=W, KH=KH, KW=KW,
                               pad=padding, bn=batch_block)

    out_flat = pl.pallas_call(
        kernel,
        out_shape=jax.ShapeDtypeStruct((N, O, HW), jnp.float32),
        grid=(N // batch_block,),
        in_specs=[
            pl.BlockSpec((batch_block, C, HW), lambda b: (b, 0, 0)),
            pl.BlockSpec((O, Kp), lambda b: (0, 0)),
        ],
        out_specs=pl.BlockSpec((batch_block, O, HW), lambda b: (b, 0, 0)),
        scratch_shapes=[pltpu.VMEM((Kp, HW), jnp.float32)],
        compiler_params=pltpu.CompilerParams(
            dimension_semantics=("parallel",),
            vmem_limit_bytes=vmem_limit),
    )(x_flat, w_packed)

    # Free reshape back to the PyTorch NCHW convention.
    return out_flat.reshape(N, O, H, W)


def _reference(x_nchw, weight_oihw, gamma, beta, running_mean, running_var,
               *, padding=1, eps=1e-3):
    """Pure-JAX reference (lax conv + eval-mode BN + ReLU)."""
    y = jax.lax.conv_general_dilated(
        x_nchw, weight_oihw,
        window_strides=(1, 1),
        padding=((padding, padding), (padding, padding)),
        dimension_numbers=("NCHW", "OIHW", "NCHW"),
        precision=jax.lax.Precision.HIGHEST)
    inv_std = 1.0 / jnp.sqrt(running_var + eps)
    y = (y - running_mean[None, :, None, None]) * inv_std[None, :, None, None]
    y = y * gamma[None, :, None, None] + beta[None, :, None, None]
    return jnp.maximum(y, 0.0)


if __name__ == "__main__":
    key = jax.random.PRNGKey(0)
    k_x, k_w, k_g, k_b, k_m, k_v = jax.random.split(key, 6)

    # Shapes consistent with ConvBlock(inp=4, outp=8, k=3, s=1, p=1).
    N, C_in, C_out, H, W = 2, 4, 8, 16, 16

    x = jax.random.normal(k_x, (N, C_in, H, W), dtype=jnp.float32)
    weight = 0.1 * jax.random.normal(k_w, (C_out, C_in, 3, 3), dtype=jnp.float32)
    gamma = 1.0 + 0.1 * jax.random.normal(k_g, (C_out,), dtype=jnp.float32)
    beta = 0.1 * jax.random.normal(k_b, (C_out,), dtype=jnp.float32)
    running_mean = 0.05 * jax.random.normal(k_m, (C_out,), dtype=jnp.float32)
    running_var = 0.5 + jnp.abs(jax.random.normal(k_v, (C_out,), dtype=jnp.float32))

    fwd = jax.jit(functools.partial(conv_block, padding=1, eps=1e-3))
    out = jax.block_until_ready(fwd(x, weight, gamma, beta, running_mean, running_var))

    ref = _reference(x, weight, gamma, beta, running_mean, running_var,
                     padding=1, eps=1e-3)
    assert out.shape == (N, C_out, H, W), out.shape
    max_err = jnp.max(jnp.abs(out - ref))
    # f32 MXU matmul with Precision.HIGHEST: expected error is well below this bound.
    assert jnp.allclose(out, ref, atol=5e-4, rtol=5e-4), f"mismatch vs reference: {max_err}"

    print("KERNEL_OK")
</pallas_src>

<mosaic_0001>
module attributes {stable_mosaic.version = 11 : i64} {
  func.func @_conv_bn_relu_kernel(%arg0: i32, %arg1: memref<1x4x256xf32, #tpu.memory_space<vmem>>, %arg2: memref<8x128xf32, #tpu.memory_space<vmem>>, %arg3: memref<1x8x256xf32, #tpu.memory_space<vmem>>, %arg4: memref<128x256xf32, #tpu.memory_space<vmem>>) attributes {dimension_semantics = [#tpu.dimension_semantics<parallel>], iteration_bounds = array<i64: 2>, scalar_prefetch = 0 : i64, scratch_operands = 1 : i64, tpu.core_type = #tpu.core_type<tc>, window_params = [{transform_indices = @transform_0, window_bounds = array<i64: 1, 4, 256>}, {pipeline_mode = #tpu.pipeline_mode<synchronous>, transform_indices = @transform_1, window_bounds = array<i64: 8, 128>}, {transform_indices = @transform_2, window_bounds = array<i64: 1, 8, 256>}]} {
    %cst = arith.constant 0.000000e+00 : f32
    %0 = vector.broadcast %cst : f32 to vector<128x256xf32>
    %c0 = arith.constant 0 : index
    %c0_0 = arith.constant 0 : index
    %1 = vector.load %arg4[%c0, %c0_0] : memref<128x256xf32, #tpu.memory_space<vmem>>, vector<128x256xf32>
    tpu.vector_store %arg4[%c0, %c0_0], %0 {strides = array<i32>} : memref<128x256xf32, #tpu.memory_space<vmem>>, vector<128x256xf32>,
    %cst_1 = arith.constant 1.000000e+00 : f32
    %2 = vector.broadcast %cst_1 : f32 to vector<1x256xf32>
    %c36 = arith.constant 36 : index
    %c0_2 = arith.constant 0 : index
    %3 = vector.load %arg4[%c36, %c0_2] : memref<128x256xf32, #tpu.memory_space<vmem>>, vector<1x256xf32>
    tpu.vector_store %arg4[%c36, %c0_2], %2 {strides = array<i32>} : memref<128x256xf32, #tpu.memory_space<vmem>>, vector<1x256xf32>,
    %4 = tpu.iota {dimensions = array<i32: 1>} : vector<1x256xi32>
    %c4_i32 = arith.constant 4 : i32
    %5 = vector.broadcast %c4_i32 : i32 to vector<1x256xi32>
    %6 = arith.shrsi %4, %5 : vector<1x256xi32>
    %c15_i32 = arith.constant 15 : i32
    %7 = vector.broadcast %c15_i32 : i32 to vector<1x256xi32>
    %8 = arith.andi %4, %7 : vector<1x256xi32>
    %c-1_i32 = arith.constant -1 : i32
    %9 = vector.broadcast %c-1_i32 : i32 to vector<1x256xi32>
    %10 = arith.addi %6, %9 : vector<1x256xi32>
    %c0_i32 = arith.constant 0 : i32
    %11 = vector.broadcast %c0_i32 : i32 to vector<1x256xi32>
    %12 = arith.cmpi sge, %10, %11 : vector<1x256xi32>
    %c-1_i32_3 = arith.constant -1 : i32
    %13 = vector.broadcast %c-1_i32_3 : i32 to vector<1x256xi32>
    %14 = arith.addi %6, %13 : vector<1x256xi32>
    %c16_i32 = arith.constant 16 : i32
    %15 = vector.broadcast %c16_i32 : i32 to vector<1x256xi32>
    %16 = arith.cmpi slt, %14, %15 : vector<1x256xi32>
    %17 = arith.andi %12, %16 : vector<1x256xi1>
    %c-1_i32_4 = arith.constant -1 : i32
    %18 = vector.broadcast %c-1_i32_4 : i32 to vector<1x256xi32>
    %19 = arith.addi %8, %18 : vector<1x256xi32>
    %c0_i32_5 = arith.constant 0 : i32
    %20 = vector.broadcast %c0_i32_5 : i32 to vector<1x256xi32>
    %21 = arith.cmpi sge, %19, %20 : vector<1x256xi32>
    %22 = arith.andi %17, %21 : vector<1x256xi1>
    %c-1_i32_6 = arith.constant -1 : i32
    %23 = vector.broadcast %c-1_i32_6 : i32 to vector<1x256xi32>
    %24 = arith.addi %8, %23 : vector<1x256xi32>
    %c16_i32_7 = arith.constant 16 : i32
    %25 = vector.broadcast %c16_i32_7 : i32 to vector<1x256xi32>
    %26 = arith.cmpi slt, %24, %25 : vector<1x256xi32>
    %27 = arith.andi %22, %26 : vector<1x256xi1>
    %28 = arith.extui %27 : vector<1x256xi1> to vector<1x256xi32>
    %29 = arith.sitofp %28 : vector<1x256xi32> to vector<1x256xf32>
    %30 = vector.shape_cast %29 : vector<1x256xf32> to vector<1x256xf32>
    %31 = vector.broadcast %30 : vector<1x256xf32> to vector<4x256xf32>
    %c-1_i32_8 = arith.constant -1 : i32
    %32 = vector.broadcast %c-1_i32_8 : i32 to vector<1x256xi32>
    %33 = arith.addi %6, %32 : vector<1x256xi32>
    %c0_i32_9 = arith.constant 0 : i32
    %34 = vector.broadcast %c0_i32_9 : i32 to vector<1x256xi32>
    %35 = arith.cmpi sge, %33, %34 : vector<1x256xi32>
    %c-1_i32_10 = arith.constant -1 : i32
    %36 = vector.broadcast %c-1_i32_10 : i32 to vector<1x256xi32>
    %37 = arith.addi %6, %36 : vector<1x256xi32>
    %c16_i32_11 = arith.constant 16 : i32
    %38 = vector.broadcast %c16_i32_11 : i32 to vector<1x256xi32>
    %39 = arith.cmpi slt, %37, %38 : vector<1x256xi32>
    %40 = arith.andi %35, %39 : vector<1x256xi1>
    %c0_i32_12 = arith.constant 0 : i32
    %41 = vector.broadcast %c0_i32_12 : i32 to vector<1x256xi32>
    %42 = arith.addi %8, %41 : vector<1x256xi32>
    %c0_i32_13 = arith.constant 0 : i32
    %43 = vector.broadcast %c0_i32_13 : i32 to vector<1x256xi32>
    %44 = arith.cmpi sge, %42, %43 : vector<1x256xi32>
    %45 = arith.andi %40, %44 : vector<1x256xi1>
    %c0_i32_14 = arith.constant 0 : i32
    %46 = vector.broadcast %c0_i32_14 : i32 to vector<1x256xi32>
    %47 = arith.addi %8, %46 : vector<1x256xi32>
    %c16_i32_15 = arith.constant 16 : i32
    %48 = vector.broadcast %c16_i32_15 : i32 to vector<1x256xi32>
    %49 = arith.cmpi slt, %47, %48 : vector<1x256xi32>
    %50 = arith.andi %45, %49 : vector<1x256xi1>
    %51 = arith.extui %50 : vector<1x256xi1> to vector<1x256xi32>
    %52 = arith.sitofp %51 : vector<1x256xi32> to vector<1x256xf32>
    %53 = vector.shape_cast %52 : vector<1x256xf32> to vector<1x256xf32>
    %54 = vector.broadcast %53 : vector<1x256xf32> to vector<4x256xf32>
    %c-1_i32_16 = arith.constant -1 : i32
    %55 = vector.broadcast %c-1_i32_16 : i32 to vector<1x256xi32>
    %56 = arith.addi %6, %55 : vector<1x256xi32>
    %c0_i32_17 = arith.constant 0 : i32
    %57 = vector.broadcast %c0_i32_17 : i32 to vector<1x256xi32>
    %58 = arith.cmpi sge, %56, %57 : vector<1x256xi32>
    %c-1_i32_18 = arith.constant -1 : i32
    %59 = vector.broadcast %c-1_i32_18 : i32 to vector<1x256xi32>
    %60 = arith.addi %6, %59 : vector<1x256xi32>
    %c16_i32_19 = arith.constant 16 : i32
    %61 = vector.broadcast %c16_i32_19 : i32 to vector<1x256xi32>
    %62 = arith.cmpi slt, %60, %61 : vector<1x256xi32>
    %63 = arith.andi %58, %62 : vector<1x256xi1>
    %c1_i32 = arith.constant 1 : i32
    %64 = vector.broadcast %c1_i32 : i32 to vector<1x256xi32>
    %65 = arith.addi %8, %64 : vector<1x256xi32>
    %c0_i32_20 = arith.constant 0 : i32
    %66 = vector.broadcast %c0_i32_20 : i32 to vector<1x256xi32>
    %67 = arith.cmpi sge, %65, %66 : vector<1x256xi32>
    %68 = arith.andi %63, %67 : vector<1x256xi1>
    %c1_i32_21 = arith.constant 1 : i32
    %69 = vector.broadcast %c1_i32_21 : i32 to vector<1x256xi32>
    %70 = arith.addi %8, %69 : vector<1x256xi32>
    %c16_i32_22 = arith.constant 16 : i32
    %71 = vector.broadcast %c16_i32_22 : i32 to vector<1x256xi32>
    %72 = arith.cmpi slt, %70, %71 : vector<1x256xi32>
    %73 = arith.andi %68, %72 : vector<1x256xi1>
    %74 = arith.extui %73 : vector<1x256xi1> to vector<1x256xi32>
    %75 = arith.sitofp %74 : vector<1x256xi32> to vector<1x256xf32>
    %76 = vector.shape_cast %75 : vector<1x256xf32> to vector<1x256xf32>
    %77 = vector.broadcast %76 : vector<1x256xf32> to vector<4x256xf32>
    %c0_i32_23 = arith.constant 0 : i32
    %78 = vector.broadcast %c0_i32_23 : i32 to vector<1x256xi32>
    %79 = arith.addi %6, %78 : vector<1x256xi32>
    %c0_i32_24 = arith.constant 0 : i32
    %80 = vector.broadcast %c0_i32_24 : i32 to vector<1x256xi32>
    %81 = arith.cmpi sge, %79, %80 : vector<1x256xi32>
    %c0_i32_25 = arith.constant 0 : i32
    %82 = vector.broadcast %c0_i32_25 : i32 to vector<1x256xi32>
    %83 = arith.addi %6, %82 : vector<1x256xi32>
    %c16_i32_26 = arith.constant 16 : i32
    %84 = vector.broadcast %c16_i32_26 : i32 to vector<1x256xi32>
    %85 = arith.cmpi slt, %83, %84 : vector<1x256xi32>
    %86 = arith.andi %81, %85 : vector<1x256xi1>
    %c-1_i32_27 = arith.constant -1 : i32
    %87 = vector.broadcast %c-1_i32_27 : i32 to vector<1x256xi32>
    %88 = arith.addi %8, %87 : vector<1x256xi32>
    %c0_i32_28 = arith.constant 0 : i32
    %89 = vector.broadcast %c0_i32_28 : i32 to vector<1x256xi32>
    %90 = arith.cmpi sge, %88, %89 : vector<1x256xi32>
    %91 = arith.andi %86, %90 : vector<1x256xi1>
    %c-1_i32_29 = arith.constant -1 : i32
    %92 = vector.broadcast %c-1_i32_29 : i32 to vector<1x256xi32>
    %93 = arith.addi %8, %92 : vector<1x256xi32>
    %c16_i32_30 = arith.constant 16 : i32
    %94 = vector.broadcast %c16_i32_30 : i32 to vector<1x256xi32>
    %95 = arith.cmpi slt, %93, %94 : vector<1x256xi32>
    %96 = arith.andi %91, %95 : vector<1x256xi1>
    %97 = arith.extui %96 : vector<1x256xi1> to vector<1x256xi32>
    %98 = arith.sitofp %97 : vector<1x256xi32> to vector<1x256xf32>
    %99 = vector.shape_cast %98 : vector<1x256xf32> to vector<1x256xf32>
    %100 = vector.broadcast %99 : vector<1x256xf32> to vector<4x256xf32>
    %c0_i32_31 = arith.constant 0 : i32
    %101 = vector.broadcast %c0_i32_31 : i32 to vector<1x256xi32>
    %102 = arith.addi %6, %101 : vector<1x256xi32>
    %c0_i32_32 = arith.constant 0 : i32
    %103 = vector.broadcast %c0_i32_32 : i32 to vector<1x256xi32>
    %104 = arith.cmpi sge, %102, %103 : vector<1x256xi32>
    %c0_i32_33 = arith.constant 0 : i32
    %105 = vector.broadcast %c0_i32_33 : i32 to vector<1x256xi32>
    %106 = arith.addi %6, %105 : vector<1x256xi32>
    %c16_i32_34 = arith.constant 16 : i32
    %107 = vector.broadcast %c16_i32_34 : i32 to vector<1x256xi32>
    %108 = arith.cmpi slt, %106, %107 : vector<1x256xi32>
    %109 = arith.andi %104, %108 : vector<1x256xi1>
    %c1_i32_35 = arith.constant 1 : i32
    %110 = vector.broadcast %c1_i32_35 : i32 to vector<1x256xi32>
    %111 = arith.addi %8, %110 : vector<1x256xi32>
    %c0_i32_36 = arith.constant 0 : i32
    %112 = vector.broadcast %c0_i32_36 : i32 to vector<1x256xi32>
    %113 = arith.cmpi sge, %111, %112 : vector<1x256xi32>
    %114 = arith.andi %109, %113 : vector<1x256xi1>
    %c1_i32_37 = arith.constant 1 : i32
    %115 = vector.broadcast %c1_i32_37 : i32 to vector<1x256xi32>
    %116 = arith.addi %8, %115 : vector<1x256xi32>
    %c16_i32_38 = arith.constant 16 : i32
    %117 = vector.broadcast %c16_i32_38 : i32 to vector<1x256xi32>
    %118 = arith.cmpi slt, %116, %117 : vector<1x256xi32>
    %119 = arith.andi %114, %118 : vector<1x256xi1>
    %120 = arith.extui %119 : vector<1x256xi1> to vector<1x256xi32>
    %121 = arith.sitofp %120 : vector<1x256xi32> to vector<1x256xf32>
    %122 = vector.shape_cast %121 : vector<1x256xf32> to vector<1x256xf32>
    %123 = vector.broadcast %122 : vector<1x256xf32> to vector<4x256xf32>
    %c1_i32_39 = arith.constant 1 : i32
    %124 = vector.broadcast %c1_i32_39 : i32 to vector<1x256xi32>
    %125 = arith.addi %6, %124 : vector<1x256xi32>
    %c0_i32_40 = arith.constant 0 : i32
    %126 = vector.broadcast %c0_i32_40 : i32 to vector<1x256xi32>
    %127 = arith.cmpi sge, %125, %126 : vector<1x256xi32>
    %c1_i32_41 = arith.constant 1 : i32
    %128 = vector.broadcast %c1_i32_41 : i32 to vector<1x256xi32>
    %129 = arith.addi %6, %128 : vector<1x256xi32>
    %c16_i32_42 = arith.constant 16 : i32
    %130 = vector.broadcast %c16_i32_42 : i32 to vector<1x256xi32>
    %131 = arith.cmpi slt, %129, %130 : vector<1x256xi32>
    %132 = arith.andi %127, %131 : vector<1x256xi1>
    %c-1_i32_43 = arith.constant -1 : i32
    %133 = vector.broadcast %c-1_i32_43 : i32 to vector<1x256xi32>
    %134 = arith.addi %8, %133 : vector<1x256xi32>
    %c0_i32_44 = arith.constant 0 : i32
    %135 = vector.broadcast %c0_i32_44 : i32 to vector<1x256xi32>
    %136 = arith.cmpi sge, %134, %135 : vector<1x256xi32>
    %137 = arith.andi %132, %136 : vector<1x256xi1>
    %c-1_i32_45 = arith.constant -1 : i32
    %138 = vector.broadcast %c-1_i32_45 : i32 to vector<1x256xi32>
    %139 = arith.addi %8, %138 : vector<1x256xi32>
    %c16_i32_46 = arith.constant 16 : i32
    %140 = vector.broadcast %c16_i32_46 : i32 to vector<1x256xi32>
    %141 = arith.cmpi slt, %139, %140 : vector<1x256xi32>
    %142 = arith.andi %137, %141 : vector<1x256xi1>
    %143 = arith.extui %142 : vector<1x256xi1> to vector<1x256xi32>
    %144 = arith.sitofp %143 : vector<1x256xi32> to vector<1x256xf32>
    %145 = vector.shape_cast %144 : vector<1x256xf32> to vector<1x256xf32>
    %146 = vector.broadcast %145 : vector<1x256xf32> to vector<4x256xf32>
    %c1_i32_47 = arith.constant 1 : i32
    %147 = vector.broadcast %c1_i32_47 : i32 to vector<1x256xi32>
    %148 = arith.addi %6, %147 : vector<1x256xi32>
    %c0_i32_48 = arith.constant 0 : i32
    %149 = vector.broadcast %c0_i32_48 : i32 to vector<1x256xi32>
    %150 = arith.cmpi sge, %148, %149 : vector<1x256xi32>
    %c1_i32_49 = arith.constant 1 : i32
    %151 = vector.broadcast %c1_i32_49 : i32 to vector<1x256xi32>
    %152 = arith.addi %6, %151 : vector<1x256xi32>
    %c16_i32_50 = arith.constant 16 : i32
    %153 = vector.broadcast %c16_i32_50 : i32 to vector<1x256xi32>
    %154 = arith.cmpi slt, %152, %153 : vector<1x256xi32>
    %155 = arith.andi %150, %154 : vector<1x256xi1>
    %c0_i32_51 = arith.constant 0 : i32
    %156 = vector.broadcast %c0_i32_51 : i32 to vector<1x256xi32>
    %157 = arith.addi %8, %156 : vector<1x256xi32>
    %c0_i32_52 = arith.constant 0 : i32
    %158 = vector.broadcast %c0_i32_52 : i32 to vector<1x256xi32>
    %159 = arith.cmpi sge, %157, %158 : vector<1x256xi32>
    %160 = arith.andi %155, %159 : vector<1x256xi1>
    %c0_i32_53 = arith.constant 0 : i32
    %161 = vector.broadcast %c0_i32_53 : i32 to vector<1x256xi32>
    %162 = arith.addi %8, %161 : vector<1x256xi32>
    %c16_i32_54 = arith.constant 16 : i32
    %163 = vector.broadcast %c16_i32_54 : i32 to vector<1x256xi32>
    %164 = arith.cmpi slt, %162, %163 : vector<1x256xi32>
    %165 = arith.andi %160, %164 : vector<1x256xi1>
    %166 = arith.extui %165 : vector<1x256xi1> to vector<1x256xi32>
    %167 = arith.sitofp %166 : vector<1x256xi32> to vector<1x256xf32>
    %168 = vector.shape_cast %167 : vector<1x256xf32> to vector<1x256xf32>
    %169 = vector.broadcast %168 : vector<1x256xf32> to vector<4x256xf32>
    %c1_i32_55 = arith.constant 1 : i32
    %170 = vector.broadcast %c1_i32_55 : i32 to vector<1x256xi32>
    %171 = arith.addi %6, %170 : vector<1x256xi32>
    %c0_i32_56 = arith.constant 0 : i32
    %172 = vector.broadcast %c0_i32_56 : i32 to vector<1x256xi32>
    %173 = arith.cmpi sge, %171, %172 : vector<1x256xi32>
    %c1_i32_57 = arith.constant 1 : i32
    %174 = vector.broadcast %c1_i32_57 : i32 to vector<1x256xi32>
    %175 = arith.addi %6, %174 : vector<1x256xi32>
    %c16_i32_58 = arith.constant 16 : i32
    %176 = vector.broadcast %c16_i32_58 : i32 to vector<1x256xi32>
    %177 = arith.cmpi slt, %175, %176 : vector<1x256xi32>
    %178 = arith.andi %173, %177 : vector<1x256xi1>
    %c1_i32_59 = arith.constant 1 : i32
    %179 = vector.broadcast %c1_i32_59 : i32 to vector<1x256xi32>
    %180 = arith.addi %8, %179 : vector<1x256xi32>
    %c0_i32_60 = arith.constant 0 : i32
    %181 = vector.broadcast %c0_i32_60 : i32 to vector<1x256xi32>
    %182 = arith.cmpi sge, %180, %181 : vector<1x256xi32>
    %183 = arith.andi %178, %182 : vector<1x256xi1>
    %c1_i32_61 = arith.constant 1 : i32
    %184 = vector.broadcast %c1_i32_61 : i32 to vector<1x256xi32>
    %185 = arith.addi %8, %184 : vector<1x256xi32>
    %c16_i32_62 = arith.constant 16 : i32
    %186 = vector.broadcast %c16_i32_62 : i32 to vector<1x256xi32>
    %187 = arith.cmpi slt, %185, %186 : vector<1x256xi32>
    %188 = arith.andi %183, %187 : vector<1x256xi1>
    %189 = arith.extui %188 : vector<1x256xi1> to vector<1x256xi32>
    %190 = arith.sitofp %189 : vector<1x256xi32> to vector<1x256xf32>
    %191 = vector.shape_cast %190 : vector<1x256xf32> to vector<1x256xf32>
    %192 = vector.broadcast %191 : vector<1x256xf32> to vector<4x256xf32>
    %c0_63 = arith.constant 0 : index
    %c0_64 = arith.constant 0 : index
    %193 = vector.load %arg2[%c0_63, %c0_64] : memref<8x128xf32, #tpu.memory_space<vmem>>, vector<8x128xf32>
    %c0_65 = arith.constant 0 : index
    %c0_66 = arith.constant 0 : index
    %c0_67 = arith.constant 0 : index
    %194 = vector.load %arg1[%c0_65, %c0_66, %c0_67] : memref<1x4x256xf32, #tpu.memory_space<vmem>>, vector<1x4x256xf32>
    %195 = vector.shape_cast %194 : vector<1x4x256xf32> to vector<4x256xf32>
    %c17_i32 = arith.constant 17 : i32
    %196 = tpu.dynamic_rotate %195 by %c17_i32 dim 1 : vector<4x256xf32>, i32 -> vector<4x256xf32>
    %197 = arith.mulf %196, %31 : vector<4x256xf32>
    %c0_68 = arith.constant 0 : index
    %c0_69 = arith.constant 0 : index
    %198 = vector.load %arg4[%c0_68, %c0_69] : memref<128x256xf32, #tpu.memory_space<vmem>>, vector<4x256xf32>
    tpu.vector_store %arg4[%c0_68, %c0_69], %197 {strides = array<i32>} : memref<128x256xf32, #tpu.memory_space<vmem>>, vector<4x256xf32>,
    %c16_i32_70 = arith.constant 16 : i32
    %199 = tpu.dynamic_rotate %195 by %c16_i32_70 dim 1 : vector<4x256xf32>, i32 -> vector<4x256xf32>
    %200 = arith.mulf %199, %54 : vector<4x256xf32>
    %c4 = arith.constant 4 : index
    %c0_71 = arith.constant 0 : index
    %201 = vector.load %arg4[%c4, %c0_71] : memref<128x256xf32, #tpu.memory_space<vmem>>, vector<4x256xf32>
    tpu.vector_store %arg4[%c4, %c0_71], %200 {strides = array<i32>} : memref<128x256xf32, #tpu.memory_space<vmem>>, vector<4x256xf32>,
    %c15_i32_72 = arith.constant 15 : i32
    %202 = tpu.dynamic_rotate %195 by %c15_i32_72 dim 1 : vector<4x256xf32>, i32 -> vector<4x256xf32>
    %203 = arith.mulf %202, %77 : vector<4x256xf32>
    %c8 = arith.constant 8 : index
    %c0_73 = arith.constant 0 : index
    %204 = vector.load %arg4[%c8, %c0_73] : memref<128x256xf32, #tpu.memory_space<vmem>>, vector<4x256xf32>
    tpu.vector_store %arg4[%c8, %c0_73], %203 {strides = array<i32>} : memref<128x256xf32, #tpu.memory_space<vmem>>, vector<4x256xf32>,
    %c1_i32_74 = arith.constant 1 : i32
    %205 = tpu.dynamic_rotate %195 by %c1_i32_74 dim 1 : vector<4x256xf32>, i32 -> vector<4x256xf32>
    %206 = arith.mulf %205, %100 : vector<4x256xf32>
    %c12 = arith.constant 12 : index
    %c0_75 = arith.constant 0 : index
    %207 = vector.load %arg4[%c12, %c0_75] : memref<128x256xf32, #tpu.memory_space<vmem>>, vector<4x256xf32>
    tpu.vector_store %arg4[%c12, %c0_75], %206 {strides = array<i32>} : memref<128x256xf32, #tpu.memory_space<vmem>>, vector<4x256xf32>,
    %c16 = arith.constant 16 : index
    %c0_76 = arith.constant 0 : index
    %208 = vector.load %arg4[%c16, %c0_76] : memref<128x256xf32, #tpu.memory_space<vmem>>, vector<4x256xf32>
    tpu.vector_store %arg4[%c16, %c0_76], %195 {strides = array<i32>} : memref<128x256xf32, #tpu.memory_space<vmem>>, vector<4x256xf32>,
    %c255_i32 = arith.constant 255 : i32
    %209 = tpu.dynamic_rotate %195 by %c255_i32 dim 1 : vector<4x256xf32>, i32 -> vector<4x256xf32>
    %210 = arith.mulf %209, %123 : vector<4x256xf32>
    %c20 = arith.constant 20 : index
    %c0_77 = arith.constant 0 : index
    %211 = vector.load %arg4[%c20, %c0_77] : memref<128x256xf32, #tpu.memory_space<vmem>>, vector<4x256xf32>
    tpu.vector_store %arg4[%c20, %c0_77], %210 {strides = array<i32>} : memref<128x256xf32, #tpu.memory_space<vmem>>, vector<4x256xf32>,
    %c241_i32 = arith.constant 241 : i32
    %212 = tpu.dynamic_rotate %195 by %c241_i32 dim 1 : vector<4x256xf32>, i32 -> vector<4x256xf32>
    %213 = arith.mulf %212, %146 : vector<4x256xf32>
    %c24 = arith.constant 24 : index
    %c0_78 = arith.constant 0 : index
    %214 = vector.load %arg4[%c24, %c0_78] : memref<128x256xf32, #tpu.memory_space<vmem>>, vector<4x256xf32>
    tpu.vector_store %arg4[%c24, %c0_78], %213 {strides = array<i32>} : memref<128x256xf32, #tpu.memory_space<vmem>>, vector<4x256xf32>,
    %c240_i32 = arith.constant 240 : i32
    %215 = tpu.dynamic_rotate %195 by %c240_i32 dim 1 : vector<4x256xf32>, i32 -> vector<4x256xf32>
    %216 = arith.mulf %215, %169 : vector<4x256xf32>
    %c28 = arith.constant 28 : index
    %c0_79 = arith.constant 0 : index
    %217 = vector.load %arg4[%c28, %c0_79] : memref<128x256xf32, #tpu.memory_space<vmem>>, vector<4x256xf32>
    tpu.vector_store %arg4[%c28, %c0_79], %216 {strides = array<i32>} : memref<128x256xf32, #tpu.memory_space<vmem>>, vector<4x256xf32>,
    %c239_i32 = arith.constant 239 : i32
    %218 = tpu.dynamic_rotate %195 by %c239_i32 dim 1 : vector<4x256xf32>, i32 -> vector<4x256xf32>
    %219 = arith.mulf %218, %192 : vector<4x256xf32>
    %c32 = arith.constant 32 : index
    %c0_80 = arith.constant 0 : index
    %220 = vector.load %arg4[%c32, %c0_80] : memref<128x256xf32, #tpu.memory_space<vmem>>, vector<4x256xf32>
    tpu.vector_store %arg4[%c32, %c0_80], %219 {strides = array<i32>} : memref<128x256xf32, #tpu.memory_space<vmem>>, vector<4x256xf32>,
    %c0_81 = arith.constant 0 : index
    %c0_82 = arith.constant 0 : index
    %221 = vector.load %arg4[%c0_81, %c0_82] : memref<128x256xf32, #tpu.memory_space<vmem>>, vector<128x256xf32>
    %cst_83 = arith.constant dense<0.000000e+00> : vector<8x256xf32>
    %222 = tpu.matmul %193, %221, %cst_83 {dimension_numbers = #tpu.dot_dimension_numbers<[1], [0], [0], [1], [0, 0, 1, 1], [], []>, precision = #tpu.contract_precision<fp32>} : vector<8x128xf32>, vector<128x256xf32>, vector<8x256xf32> -> vector<8x256xf32>
    %cst_84 = arith.constant 0.000000e+00 : f32
    %223 = vector.broadcast %cst_84 : f32 to vector<8x256xf32>
    %224 = arith.maximumf %222, %223 : vector<8x256xf32>
    %c0_85 = arith.constant 0 : index
    %c0_86 = arith.constant 0 : index
    %c0_87 = arith.constant 0 : index
    %225 = vector.load %arg3[%c0_85, %c0_86, %c0_87] : memref<1x8x256xf32, #tpu.memory_space<vmem>>, vector<1x8x256xf32>
    %226 = vector.shape_cast %225 : vector<1x8x256xf32> to vector<8x256xf32>
    %227 = vector.shape_cast %224 : vector<8x256xf32> to vector<1x8x256xf32>
    tpu.vector_store %arg3[%c0_85, %c0_86, %c0_87], %227 {strides = array<i32>} : memref<1x8x256xf32, #tpu.memory_space<vmem>>, vector<1x8x256xf32>,
    return
  }
  func.func @transform_0(%arg0: i32) -> (i32, i32, i32) {
    %c0_i32 = arith.constant 0 : i32
    %c0_i32_0 = arith.constant 0 : i32
    %c0_i32_1 = arith.constant 0 : i32
    return %arg0, %c0_i32, %c0_i32_0 : i32, i32, i32
  }
  func.func @transform_1(%arg0: i32) -> (i32, i32) {
    %c0_i32 = arith.constant 0 : i32
    %c0_i32_0 = arith.constant 0 : i32
    %c0_i32_1 = arith.constant 0 : i32
    return %c0_i32, %c0_i32_0 : i32, i32
  }
  func.func @transform_2(%arg0: i32) -> (i32, i32, i32) {
    %c0_i32 = arith.constant 0 : i32
    %c0_i32_0 = arith.constant 0 : i32
    %c0_i32_1 = arith.constant 0 : i32
    return %arg0, %c0_i32, %c0_i32_0 : i32, i32, i32
  }
}

</mosaic_0001>

<bundles_post_ra>
// kernel: conv_block.1
= control target key start
LH: loop header
LB: loop body
LE: loop exit
PB: predicated region body
PF: predicated region fallthrough
CT: control target
= control target key end

     0   :  { %s1438_s9 = smov 0   ;;  %s1969_s0 = inlined_call_operand.vmem [shape: f32[2,4,256], index: 0, kind: input, shape index: {}]   ;;  %s1970_s1 = inlined_call_operand.vmem [shape: f32[8,128], index: 1, kind: input, shape index: {}]   ;;  %s1971_s2 = inlined_call_operand.vmem [shape: f32[2,8,256], index: 2, kind: output, shape index: {}]  }
   0x1 LB: > { %s1357_s10 = sadd.s32 4294967295, %s1411_s9   ;;  %p1361_p0 = scmp.ge.s32.totalorder %s1411_s9, 1  ;;  %s1411_s9 = sphi %s1438_s9, %s12_s9  }
   0x2   : > { %p112_p1 = scmp.lt.s32.totalorder %s1411_s9, 3 }
   0x4   : > { %p113_p2 = pnand %p1361_p0, %p112_p1 }
   0x5   : > { %p1446_p3 = scmp.lt.s32.totalorder (!%p113_p2), %s1357_s10, 1  ;;  %s1415_s16 = smov (!%p113_p2), 111  }
   0x6   : > { %116 = sbr.rel (%p113_p2) target bundleno = 449 (0x1c1), region = 28  ;;  %s1416_s17 = smov (!%p113_p2), 112  }
   0x7   : > { %s1417_s18 = smov (!%p113_p2), 127   ;;  %s1418_s19 = smov (!%p113_p2), 113  }
   0x8   : > { %s1419_s20 = smov (!%p113_p2), 1   ;;  %s1420_s21 = smov (!%p113_p2), 16  }
   0x9   : > { %s1421_s22 = smov (!%p113_p2), 15   ;;  %s1422_s23 = smov (!%p113_p2), 17  }
   0xb   : > { %v176_v0 = vlaneseq  ;;  %v1413_v1 = vmov 0.0   ;;  %s1994_s10 = smov (!%p1446_p3, %s1357_s10), 1  ;;  %v1414_v2 = vmov 1.0  }
   0xc   : > { %144 = vst [vmem:[#allocation2] sm:$0xff] %v1413_v1  ;;  %145 = vst [vmem:[#allocation2 + $0x8] sm:$0xff] %v1413_v1  ;;  %539 = vmatprep.mubr.f32.mxu0 %v1413_v1  ;;  %775 = vmatprep.mubr.f32.mxu1 %v1413_v1  ;;  %s1384_s12 = sshll.u32 %s1994_s10, 3  ;;  %s1385_s26 = sshll.u32 %s1994_s10, 4 }
   0xd   : > { %146 = vst [vmem:[#allocation2 + $0x10] sm:$0xff] %v1413_v1  ;;  %147 = vst [vmem:[#allocation2 + $0x18] sm:$0xff] %v1413_v1  ;;  %vm178_vm0 = vcmp.lt.s32.totalorder %v176_v0, 256  ;;  %444 = vmatprep.subr.mxu0 %v1413_v1  ;;  %s138_s15 = scalar_lea.vmem %s1969_s0, %s1384_s12  ;;  %556 = vmatprep.subr.mxu1 %v1413_v1  ;;  %v1529_v5 = vand.u32 127, %v176_v0  ;;  %s143_s29 = scalar_lea.vmem %s1971_s2, %s1385_s26 }
   0xe   : > { %148 = vst [vmem:[#allocation2 + $0x20] sm:$0xff] %v1413_v1  ;;  %149 = vst [vmem:[#allocation2 + $0x28] sm:$0xff] %v1413_v1  ;;  %446 = vmatpush1.msra.mxu0 %v1413_v1  ;;  %v1474_v3 = vld [vmem:[%s138_s15] sm:$0xff]  ;;  %562 = vmatpush1.msra.mxu1 %v1413_v1 }
   0xf   : > { %150 = vst [vmem:[#allocation2 + $0x30] sm:$0xff] %v1413_v1  ;;  %151 = vst [vmem:[#allocation2 + $0x38] sm:$0xff] %v1413_v1  ;;  %448 = vmatprep.subr.mxu0 %v1413_v1  ;;  %400 = vrot.lane.b32.xlu1 %v1474_v3, %s1415_s16  ;;  %v295_v4 = vcombine.high %v1474_v3, %v1474_v3  ;;  %v185_v6 = vadd.s32 128, %v1529_v5  ;;  %v186_v7 = vshra.s32 %v1529_v5, 4  ;;  %v188_v9 = vand.u32 15, %v1529_v5 }
  0x10   : > { %152 = vst [vmem:[#allocation2 + $0x40] sm:$0xff] %v1413_v1  ;;  %153 = vst [vmem:[#allocation2 + $0x48] sm:$0xff] %v1413_v1  ;;  %450 = vmatpush1.msra.mxu0 %v1413_v1  ;;  %383 = vrot.lane.b32.xlu0 %v1474_v3, %s1416_s17 }
  0x11   : > { %181 = vst.msk [vmem:[#allocation2 + $0x44] ss:$8 sm:$0x3] %vm178_vm0, %v1414_v2  ;;  %353 = vst [vmem:[#allocation2 + $0x20] sm:$0xf] %v1474_v3  ;;  %452 = vmatprep.subr.mxu0 %v1413_v1  ;;  %568 = vmatprep.subr.mxu1 %v1413_v1  ;;  %v187_v8 = vshra.s32 %v185_v6, 4 }
  0x12   : > { %354 = vst [vmem:[#allocation2 + $0x28] sm:$0xf] %v295_v4  ;;  %454 = vmatpush1.msra.mxu0 %v1413_v1  ;;  %574 = vmatpush1.msra.mxu1 %v1413_v1  ;;  %v189_v10 = vand.u32 15, %v185_v6  ;;  %v260_v11 = vadd.s32 1, %v186_v7  ;;  %v1534_v13 = vadd.s32 1, %v188_v9  ;;  %vm238_vm5 = vcmp.ge.s32.totalorder %v186_v7, 0 }
  0x13   : > { %456 = vmatprep.subr.mxu0 %v1413_v1  ;;  %402 = vrot.lane.b32.xlu1 %v295_v4, %s1415_s16  ;;  %v261_v12 = vadd.s32 1, %v187_v8  ;;  %vm240_vm6 = vcmp.lt.s32.totalorder %v186_v7, 16  ;;  %vm239_vm11 = vcmp.ge.s32.totalorder %v187_v8, 0  ;;  %vm241_vm12 = vcmp.lt.s32.totalorder %v187_v8, 16 }
  0x14   : > { %355 = vrot.lane.b32.xlu0 %v1474_v3, %s1417_s18  ;;  %458 = vmatpush1.msra.mxu0 %v1413_v1  ;;  %v1536_v14 = vadd.s32 1, %v189_v10  ;;  %vm262_vm1 = vcmp.ge.s32.totalorder %v260_v11, 0  ;;  %vm264_vm2 = vcmp.lt.s32.totalorder %v260_v11, 16  ;;  %vm230_vm7 = vcmp.lt.s32.totalorder %v1534_v13, 16  ;;  %vm1548_vm13 = vmand %vm238_vm5, %vm240_vm6 }
  0x15   : > { %460 = vmatprep.subr.mxu0 %v1413_v1  ;;  %580 = vmatprep.subr.mxu1 %v1413_v1  ;;  %vm263_vm3 = vcmp.ge.s32.totalorder %v261_v12, 0  ;;  %vm265_vm4 = vcmp.lt.s32.totalorder %v261_v12, 16  ;;  %vm1539_vm8 = vmand %vm262_vm1, %vm264_vm2  ;;  %v1560_v20 = vadd.s32 4294967295, %v188_v9  ;;  %v1566_v22 = vadd.s32 4294967295, %v189_v10  ;;  %v292_v9 = vld [vmem:[%s1970_s1] sm:$0xff] }
  0x16   : > { %462 = vmatpush1.msra.mxu0 %v1413_v1  ;;  %586 = vmatpush1.msra.mxu1 %v1413_v1  ;;  %vm231_vm9 = vcmp.lt.s32.totalorder %v1536_v14, 16  ;;  %vm1544_vm10 = vmand %vm263_vm3, %vm265_vm4  ;;  %vm404_vm1 = vcmp.lt.s32.totalorder %v1529_v5, 111  ;;  %vm359_vm5 = vcmp.lt.s32.totalorder %v1529_v5, 127  ;;  %v1378_v33 = vsel %vm1539_vm8, 1.0, %v1413_v1 }
  0x17   : > { %357 = vrot.lane.b32.xlu1 %v295_v4, %s1417_s18  ;;  %464 = vmatprep.subr.mxu0 %v1413_v1  ;;  %vm286_vm14 = vmand %vm1539_vm8, %vm230_vm7  ;;  %vm200_vm4 = vcmp.ge.s32.totalorder %v1560_v20, 0  ;;  %vm201_vm6 = vcmp.ge.s32.totalorder %v1566_v22, 0  ;;  %v1379_v34 = vsel %vm1544_vm10, 1.0, %v1413_v1  ;;  %v190_v36 = vadd.s32 4294967295, %v186_v7 }
  0x18   : > { %385 = vrot.lane.b32.xlu0 %v295_v4, %s1416_s17  ;;  %466 = vmatpush1.msra.mxu0 %v1413_v1  ;;  %vm287_vm15 = vmand %vm1544_vm10, %vm231_vm9  ;;  %v1380_v23 = vsel %vm286_vm14, 1.0, %v1413_v1  ;;  %v191_v39 = vadd.s32 4294967295, %v187_v8  ;;  %v1680_v21 = vand.u32 4294901760, %v292_v9 }
  0x19   : > { %468 = vmatprep.subr.mxu0 %v1413_v1  ;;  %592 = vmatprep.subr.mxu1 %v1413_v1  ;;  %vm1562_vm0 = vmand %vm239_vm11, %vm241_vm12  ;;  %v1381_v24 = vsel %vm287_vm15, 1.0, %v1413_v1  ;;  %vm387_vm11 = vcmp.lt.s32.totalorder %v1529_v5, 112  ;;  %vm376_vm15 = vcmp.lt.s32.totalorder %v1529_v5, 113 }
  0x1a   : > { %470 = vmatpush1.msra.mxu0 %v1413_v1  ;;  %598 = vmatpush1.msra.mxu1 %v1413_v1  ;;  %vm254_vm2 = vmand %vm1548_vm13, %vm230_vm7 }
  0x1b   : > { %374 = vrot.lane.b32.xlu1 %v295_v4, %s1418_s19  ;;  %472 = vmatprep.subr.mxu0 %v1413_v1  ;;  %vm255_vm3 = vmand %vm1562_vm0, %vm231_vm9  ;;  %v1374_v31 = vsel %vm254_vm2, 1.0, %v1413_v1 }
  0x1c   : > { %372 = vrot.lane.b32.xlu0 %v1474_v3, %s1418_s19  ;;  %474 = vmatpush1.msra.mxu0 %v1413_v1  ;;  %v1375_v32 = vsel %vm255_vm3, 1.0, %v1413_v1  ;;  %vm1595_vm12 = vmand %vm1539_vm8, %vm200_vm4  ;;  %vm195_vm3 = vcmp.lt.s32.totalorder %v191_v39, 16 }
  0x1d   : > { %604 = vmatprep.subr.mxu1 %v1413_v1  ;;  %476 = vmatprep.subr.mxu0 %v1413_v1  ;;  %vm269_vm14 = vmand %vm1544_vm10, %vm201_vm6  ;;  %v1376_v48 = vsel %vm1595_vm12, 1.0, %v1413_v1  ;;  %vm192_vm10 = vcmp.ge.s32.totalorder %v190_v36, 0  ;;  %vm312_vm12 = vcmp.lt.s32.totalorder %v1529_v5, 16 }
  0x1e   : > { %610 = vmatpush1.msra.mxu1 %v1413_v1  ;;  %478 = vmatpush1.msra.mxu0 %v1413_v1  ;;  %v1377_v49 = vsel %vm269_vm14, 1.0, %v1413_v1  ;;  %vm1620_vm8 = vmand %vm1548_vm13, %vm200_vm4  ;;  %vm193_vm13 = vcmp.ge.s32.totalorder %v191_v39, 0 }
  0x1f   : > { %338 = vrot.lane.b32.xlu1 %v295_v4, %s1419_s20  ;;  %616 = vmatprep.subr.mxu1 %v1413_v1  ;;  %vm245_vm2 = vmand %vm1562_vm0, %vm201_vm6  ;;  %v1372_v61 = vsel %vm1620_vm8, 1.0, %v1413_v1  ;;  %vm301_vm8 = vcmp.lt.s32.totalorder %v1529_v5, 17 }
  0x20   : > { %336 = vrot.lane.b32.xlu0 %v1474_v3, %s1419_s20  ;;  %480 = vmatprep.subr.mxu0 %v1413_v1  ;;  %v1373_v62 = vsel %vm245_vm2, 1.0, %v1413_v1 }
  0x21   : > { %622 = vmatpush1.msra.mxu1 %v1413_v1  ;;  %482 = vmatpush1.msra.mxu0 %v1413_v1 }
  0x22   : > { %628 = vmatprep.subr.mxu1 %v1413_v1  ;;  %484 = vmatprep.subr.mxu0 %v1413_v1 }
  0x23   : > { %310 = vrot.lane.b32.xlu1 %v295_v4, %s1420_s21  ;;  %634 = vmatpush1.msra.mxu1 %v1413_v1 }
  0x24   : > { %308 = vrot.lane.b32.xlu0 %v1474_v3, %s1420_s21  ;;  %486 = vmatpush1.msra.mxu0 %v1413_v1 }
  0x25   : > { %640 = vmatprep.subr.mxu1 %v1413_v1 }
  0x26   : > { %646 = vmatpush1.msra.mxu1 %v1413_v1 }
  0x27   : > { %327 = vrot.lane.b32.xlu1 %v295_v4, %s1421_s22  ;;  %652 = vmatprep.subr.mxu1 %v1413_v1 }
  0x28   : > { %325 = vrot.lane.b32.xlu0 %v1474_v3, %s1421_s22  ;;  %658 = vmatpush1.msra.mxu1 %v1413_v1 }
  0x29   : > { %664 = vmatprep.subr.mxu1 %v1413_v1 }
  0x2a   : > { %670 = vmatpush1.msra.mxu1 %v1413_v1 }
  0x2b   : > { %299 = vrot.lane.b32.xlu1 %v295_v4, %s1422_s23  ;;  %676 = vmatprep.subr.mxu1 %v1413_v1 }
  0x2c   : > { %297 = vrot.lane.b32.xlu0 %v1474_v3, %s1422_s23  ;;  %682 = vmatpush1.msra.mxu1 %v1413_v1 }
  0x81   : > { %v401_v18 = vpop.permute.xlu1 %400 }
  0x82   : > { %v384_v19 = vpop.permute.xlu0 %383 }
  0x85   : > { %v403_v26 = vpop.permute.xlu1 %402 }
  0x86   : > { %v356_v25 = vpop.permute.xlu0 %355  ;;  %v405_v27 = vsel %vm404_vm1, %v401_v18, %v403_v26  ;;  %v406_v28 = vsel %vm404_vm1, %v403_v26, %v401_v18  ;;  %vm194_vm1 = vcmp.lt.s32.totalorder %v190_v36, 16 }
  0x87   : > { %v407_v29 = vmul.f32 %v1380_v23, %v405_v27  ;;  %v408_v30 = vmul.f32 %v1381_v24, %v406_v28  ;;  %vm1639_vm0 = vmand %vm192_vm10, %vm194_vm1 }
  0x88   : > { %vm1662_vm14 = vmand %vm1639_vm0, %vm230_vm7  ;;  %vm329_vm7 = vcmp.lt.s32.totalorder %v1529_v5, 15 }
  0x89   : > { %409 = vst [vmem:[#allocation2 + $0x40] sm:$0xf] %v407_v29  ;;  %410 = vst [vmem:[#allocation2 + $0x48] sm:$0xf] %v408_v30  ;;  %v358_v37 = vpop.permute.xlu1 %357 }
  0x8a   : > { %v386_v38 = vpop.permute.xlu0 %385  ;;  %v360_v40 = vsel %vm359_vm5, %v356_v25, %v358_v37  ;;  %v361_v41 = vsel %vm359_vm5, %v358_v37, %v356_v25  ;;  %vm340_vm5 = vcmp.lt.s32.totalorder %v1529_v5, 1 }
  0x8b   : > { %v388_v42 = vsel %vm387_vm11, %v384_v19, %v386_v38  ;;  %v389_v43 = vsel %vm387_vm11, %v386_v38, %v384_v19  ;;  %v362_v44 = vmul.f32 %v1374_v31, %v360_v40  ;;  %v363_v45 = vmul.f32 %v1375_v32, %v361_v41  ;;  %vm1649_vm11 = vmand %vm193_vm13, %vm195_vm3 }
  0x8c   : > { %v390_v46 = vmul.f32 %v1378_v33, %v388_v42  ;;  %v391_v47 = vmul.f32 %v1379_v34, %v389_v43  ;;  %v1368_v19 = vsel %vm1639_vm0, 1.0, %v1413_v1  ;;  %v1369_v13 = vsel %vm1649_vm11, 1.0, %v1413_v1 }
  0x8d   : > { %v366_v51 = vrot.slane %v362_v44, 4  ;;  %v367_v52 = vrot.slane %v363_v45, 4  ;;  %v375_v55 = vpop.permute.xlu1 %374  ;;  %v1370_v31 = vsel %vm1662_vm14, 1.0, %v1413_v1  ;;  %v1716_v43 = vsub.f32 %v292_v9, %v1680_v21 }
  0x8e   : > { %v394_v53 = vrot.slane %v390_v46, 4  ;;  %v395_v54 = vrot.slane %v391_v47, 4  ;;  %v373_v56 = vpop.permute.xlu0 %372 }
  0x8f   : > { %v377_v57 = vsel %vm376_vm15, %v373_v56, %v375_v55  ;;  %v378_v58 = vsel %vm376_vm15, %v375_v55, %v373_v56  ;;  %370 = vst [vmem:[#allocation2 + $0x20] sm:$0xf0] %v366_v51  ;;  %371 = vst [vmem:[#allocation2 + $0x28] sm:$0xf0] %v367_v52 }
  0x90   : > { %398 = vst [vmem:[#allocation2 + $0x30] sm:$0xf0] %v394_v53  ;;  %399 = vst [vmem:[#allocation2 + $0x38] sm:$0xf0] %v395_v54  ;;  %v379_v59 = vmul.f32 %v1376_v48, %v377_v57  ;;  %v380_v60 = vmul.f32 %v1377_v49, %v378_v58  ;;  %v420_v63 = vld [vmem:[#allocation2 + $0x48] sm:$0xff]  ;;  %v419_v0 = vld [vmem:[#allocation2 + $0x40] sm:$0xff] }
  0x91   : > { %v339_v3 = vpop.permute.xlu1 %338  ;;  %v1643_v6 = vand.u32 4294901760, %v420_v63  ;;  %v1645_v7 = vand.u32 4294901760, %v419_v0  ;;  %vm233_vm15 = vmand %vm1649_vm11, %vm231_vm9 }
  0x92   : > { %381 = vst [vmem:[#allocation2 + $0x30] sm:$0xf] %v379_v59  ;;  %382 = vst [vmem:[#allocation2 + $0x38] sm:$0xf] %v380_v60  ;;  %v337_v4 = vpop.permute.xlu0 %336  ;;  %v1371_v37 = vsel %vm233_vm15, 1.0, %v1413_v1 }
  0x93   : > { %v341_v10 = vsel %vm340_vm5, %v337_v4, %v339_v3  ;;  %v342_v11 = vsel %vm340_vm5, %v339_v3, %v337_v4  ;;  %488 = vmatprep.subr.mxu0 %v1643_v6  ;;  %v1667_v17 = vsub.f32 %v420_v63, %v1643_v6  ;;  %v1670_v18 = vsub.f32 %v419_v0, %v1645_v7  ;;  %vm1707_vm9 = vmand %vm1639_vm0, %vm200_vm4 }
  0x94   : > { %v343_v12 = vmul.f32 %v1372_v61, %v342_v11  ;;  %v344_v15 = vmul.f32 %v1373_v62, %v341_v10  ;;  %490 = vmatpush1.msra.mxu0 %v1645_v7  ;;  %vm203_vm4 = vmand %vm1649_vm11, %vm201_vm6  ;;  %v1366_v22 = vsel %vm1707_vm9, 1.0, %v1413_v1 }
  0x95   : > { %v311_v25 = vpop.permute.xlu1 %310  ;;  %v685_v27 = vand.u32 4294901760, %v1667_v17  ;;  %v691_v28 = vand.u32 4294901760, %v1670_v18  ;;  %v1367_v56 = vsel %vm203_vm4, 1.0, %v1413_v1 }
  0x96   : > { %v347_v23 = vrot.slane %v343_v12, 4  ;;  %v348_v24 = vrot.slane %v344_v15, 4  ;;  %v309_v26 = vpop.permute.xlu0 %308  ;;  %v416_v14 = vld [vmem:[#allocation2 + $0x28] sm:$0xff]  ;;  %v415_v32 = vld [vmem:[#allocation2 + $0x20] sm:$0xff]  ;;  %v542_v12 = vand.u32 4294901760, %v1716_v43 }
  0x97   : > { %v313_v29 = vsel %vm312_vm12, %v309_v26, %v311_v25  ;;  %v314_v30 = vsel %vm312_vm12, %v311_v25, %v309_v26  ;;  %v686_v35 = vsub.f32 %v1667_v17, %v685_v27  ;;  %v692_v36 = vsub.f32 %v1670_v18, %v691_v28 }
  0x98   : > { %351 = vst [vmem:[#allocation2 + $0x10] sm:$0xf0] %v347_v23  ;;  %352 = vst [vmem:[#allocation2 + $0x18] sm:$0xf0] %v348_v24  ;;  %v315_v33 = vmul.f32 %v1368_v19, %v314_v30  ;;  %v316_v34 = vmul.f32 %v1369_v13, %v313_v29  ;;  %v1711_v41 = vand.u32 4294901760, %v416_v14  ;;  %v1713_v42 = vand.u32 4294901760, %v415_v32 }
  0x99   : > { %v418_v38 = vld [vmem:[#allocation2 + $0x38] sm:$0xff]  ;;  %v417_v39 = vld [vmem:[#allocation2 + $0x30] sm:$0xff]  ;;  %v328_v46 = vpop.permute.xlu1 %327  ;;  %v687_v20 = vand.u32 4294901760, %v686_v35  ;;  %v693_v52 = vand.u32 4294901760, %v692_v36  ;;  %v543_v26 = vsub.f32 %v1716_v43, %v542_v12 }
  0x9a   : > { %v319_v44 = vrot.slane %v315_v33, 4  ;;  %v320_v45 = vrot.slane %v316_v34, 4  ;;  %v326_v47 = vpop.permute.xlu0 %325  ;;  %v1718_v48 = vand.u32 4294901760, %v418_v38  ;;  %v1728_v51 = vand.u32 4294901760, %v417_v39 }
  0x9b   : > { %v330_v49 = vsel %vm329_vm7, %v326_v47, %v328_v46  ;;  %v331_v50 = vsel %vm329_vm7, %v328_v46, %v326_v47  ;;  %688 = vmatprep.subr.mxu1 %v687_v20  ;;  %v1743_v58 = vsub.f32 %v416_v14, %v1711_v41  ;;  %v1746_v59 = vsub.f32 %v415_v32, %v1713_v42 }
  0x9c   : > { %323 = vst [vmem:[#allocation2] sm:$0xf0] %v319_v44  ;;  %324 = vst [vmem:[#allocation2 + $0x8] sm:$0xf0] %v320_v45  ;;  %v332_v53 = vmul.f32 %v1370_v31, %v331_v50  ;;  %v333_v54 = vmul.f32 %v1371_v37, %v330_v49  ;;  %492 = vmatprep.subr.mxu0 %v1718_v48  ;;  %v1735_v55 = vsub.f32 %v418_v38, %v1718_v48 }
  0x9d   : > { %494 = vmatpush1.msra.mxu0 %v1728_v51  ;;  %694 = vmatpush1.msra.mxu1 %v693_v52  ;;  %v1740_v57 = vsub.f32 %v417_v39, %v1728_v51  ;;  %v300_v60 = vpop.permute.xlu1 %299  ;;  %v709_v3 = vand.u32 4294901760, %v1743_v58  ;;  %v715_v10 = vand.u32 4294901760, %v1746_v59  ;;  %v544_v34 = vand.u32 4294901760, %v543_v26 }
  0x9e   : > { %334 = vst [vmem:[#allocation2 + $0x10] sm:$0xf] %v332_v53  ;;  %335 = vst [vmem:[#allocation2 + $0x18] sm:$0xf] %v333_v54  ;;  %v298_v61 = vpop.permute.xlu0 %297  ;;  %496 = vmatprep.subr.mxu0 %v1711_v41  ;;  %v697_v62 = vand.u32 4294901760, %v1735_v55 }
  0x9f   : > { %v302_v63 = vsel %vm301_vm8, %v298_v61, %v300_v60  ;;  %v303_v0 = vsel %vm301_vm8, %v300_v60, %v298_v61  ;;  %498 = vmatpush1.msra.mxu0 %v1713_v42  ;;  %v703_v2 = vand.u32 4294901760, %v1740_v57  ;;  %v710_v5 = vsub.f32 %v1743_v58, %v709_v3 }
  0xa0   : > { %v304_v4 = vmul.f32 %v1366_v22, %v303_v0  ;;  %v305_v8 = vmul.f32 %v1367_v56, %v302_v63  ;;  %v698_v9 = vsub.f32 %v1735_v55, %v697_v62  ;;  %v716_v16 = vsub.f32 %v1746_v59, %v715_v10 }
  0xa1   : > { %v704_v11 = vsub.f32 %v1740_v57, %v703_v2  ;;  %v711_v13 = vand.u32 4294901760, %v710_v5 }
  0xa2   : > { %306 = vst [vmem:[#allocation2] sm:$0xf] %v304_v4  ;;  %307 = vst [vmem:[#allocation2 + $0x8] sm:$0xf] %v305_v8  ;;  %v699_v15 = vand.u32 4294901760, %v698_v9  ;;  %v717_v23 = vand.u32 4294901760, %v716_v16 }
  0xa3   : > { %v705_v19 = vand.u32 4294901760, %v704_v11 }
  0xa4   : > { %700 = vmatprep.subr.mxu1 %v699_v15 }
  0xa5   : > { %706 = vmatpush1.msra.mxu1 %v705_v19  ;;  %v414_v24 = vld [vmem:[#allocation2 + $0x18] sm:$0xff]  ;;  %v413_v25 = vld [vmem:[#allocation2 + $0x10] sm:$0xff] }
  0xa6   : > { %712 = vmatprep.subr.mxu1 %v711_v13  ;;  %v1774_v29 = vand.u32 4294901760, %v414_v24  ;;  %v1776_v30 = vand.u32 4294901760, %v413_v25 }
  0xa7   : > { %718 = vmatpush1.msra.mxu1 %v717_v23 }
  0xa8   : > { %500 = vmatprep.subr.mxu0 %v1774_v29  ;;  %v1780_v31 = vsub.f32 %v414_v24, %v1774_v29  ;;  %v1783_v14 = vsub.f32 %v413_v25, %v1776_v30 }
  0xa9   : > { %502 = vmatpush1.msra.mxu0 %v1776_v30  ;;  %v412_v32 = vld [vmem:[#allocation2 + $0x8] sm:$0xff]  ;;  %v411_v33 = vld [vmem:[#allocation2] sm:$0xff] }
  0xaa   : > { %v1786_v35 = vand.u32 4294901760, %v412_v32  ;;  %v1788_v36 = vand.u32 4294901760, %v411_v33  ;;  %v721_v37 = vand.u32 4294901760, %v1780_v31  ;;  %v727_v38 = vand.u32 4294901760, %v1783_v14 }
  0xac   : > { %504 = vmatprep.subr.mxu0 %v1786_v35  ;;  %v722_v39 = vsub.f32 %v1780_v31, %v721_v37  ;;  %v728_v40 = vsub.f32 %v1783_v14, %v727_v38  ;;  %v1800_v44 = vsub.f32 %v412_v32, %v1786_v35  ;;  %v1803_v45 = vsub.f32 %v411_v33, %v1788_v36 }
  0xad   : > { %506 = vmatpush1.msra.mxu0 %v1788_v36 }
  0xae   : > { %785 = vmatprep.subr.mxu0 %v1413_v1  ;;  %545 = vmatmul.mubr.f32.vlgmr.msra.gmra.mxu0 %v544_v34  ;;  %v723_v46 = vand.u32 4294901760, %v722_v39  ;;  %v729_v47 = vand.u32 4294901760, %v728_v40  ;;  %v733_v20 = vand.u32 4294901760, %v1800_v44  ;;  %v739_v49 = vand.u32 4294901760, %v1803_v45 }
  0xaf   : > { %788 = vmatpush1.msra.mxu0 %v1413_v1  ;;  %911 = vmatprep.mubr.f32.mxu0 %v1413_v1 }
  0xb0   : > { %724 = vmatprep.subr.mxu1 %v723_v46  ;;  %791 = vmatprep.subr.mxu0 %v1413_v1  ;;  %v734_v50 = vsub.f32 %v1800_v44, %v733_v20  ;;  %v740_v52 = vsub.f32 %v1803_v45, %v739_v49 }
  0xb1   : > { %730 = vmatpush1.msra.mxu1 %v729_v47  ;;  %794 = vmatpush1.msra.mxu0 %v1413_v1 }
  0xb2   : > { %797 = vmatprep.subr.mxu0 %v1413_v1  ;;  %v735_v53 = vand.u32 4294901760, %v734_v50  ;;  %v741_v54 = vand.u32 4294901760, %v740_v52 }
  0xb3   : > { %800 = vmatpush1.msra.mxu0 %v1413_v1 }
  0xb4   : > { %736 = vmatprep.subr.mxu1 %v735_v53  ;;  %803 = vmatprep.subr.mxu0 %v1413_v1 }
  0xb5   : > { %742 = vmatpush1.msra.mxu1 %v741_v54  ;;  %806 = vmatpush1.msra.mxu0 %v1413_v1 }
  0xb6   : > { %777 = vmatmul.mubr.f32.vlgmr.msra.gmra.mxu1 %v1680_v21  ;;  %809 = vmatprep.subr.mxu0 %v1413_v1 }
  0xb7   : > { %921 = vmatprep.subr.mxu1 %v1413_v1  ;;  %812 = vmatpush1.msra.mxu0 %v1413_v1 }
  0xb8   : > { %923 = vmatpush1.msra.mxu1 %v1413_v1  ;;  %815 = vmatprep.subr.mxu0 %v1413_v1 }
  0xb9   : > { %925 = vmatprep.subr.mxu1 %v1413_v1  ;;  %818 = vmatpush1.msra.mxu0 %v1413_v1 }
  0xba   : > { %927 = vmatpush1.msra.mxu1 %v1413_v1  ;;  %821 = vmatprep.subr.mxu0 %v1413_v1 }
  0xbb   : > { %929 = vmatprep.subr.mxu1 %v1413_v1  ;;  %824 = vmatpush1.msra.mxu0 %v1413_v1 }
  0xbc   : > { %931 = vmatpush1.msra.mxu1 %v1413_v1  ;;  %827 = vmatprep.subr.mxu0 %v1413_v1 }
  0xbd   : > { %933 = vmatprep.subr.mxu1 %v1413_v1  ;;  %830 = vmatpush1.msra.mxu0 %v1413_v1 }
  0xbe   : > { %935 = vmatpush1.msra.mxu1 %v1413_v1  ;;  %833 = vmatprep.subr.mxu0 %v1413_v1 }
  0xbf   : > { %937 = vmatprep.subr.mxu1 %v1413_v1  ;;  %836 = vmatpush1.msra.mxu0 %v1413_v1 }
  0xc0   : > { %939 = vmatpush1.msra.mxu1 %v1413_v1  ;;  %839 = vmatprep.subr.mxu0 %v1413_v1 }
  0xc1   : > { %941 = vmatprep.subr.mxu1 %v1413_v1  ;;  %842 = vmatpush1.msra.mxu0 %v1413_v1 }
  0xc2   : > { %943 = vmatpush1.msra.mxu1 %v1413_v1  ;;  %845 = vmatprep.subr.mxu0 %v1413_v1 }
  0xc3   : > { %945 = vmatprep.subr.mxu1 %v1413_v1  ;;  %848 = vmatpush1.msra.mxu0 %v1413_v1 }
  0xc4   : > { %947 = vmatpush1.msra.mxu1 %v1413_v1  ;;  %851 = vmatprep.subr.mxu0 %v1667_v17 }
  0xc5   : > { %949 = vmatprep.subr.mxu1 %v1413_v1  ;;  %854 = vmatpush1.msra.mxu0 %v1670_v18 }
  0xc6   : > { %951 = vmatpush1.msra.mxu1 %v1413_v1  ;;  %857 = vmatprep.subr.mxu0 %v1735_v55 }
  0xc7   : > { %953 = vmatprep.subr.mxu1 %v1413_v1  ;;  %860 = vmatpush1.msra.mxu0 %v1740_v57 }
  0xc8   : > { %955 = vmatpush1.msra.mxu1 %v1413_v1  ;;  %863 = vmatprep.subr.mxu0 %v1743_v58 }
  0xc9   : > { %957 = vmatprep.subr.mxu1 %v1413_v1  ;;  %866 = vmatpush1.msra.mxu0 %v1746_v59 }
  0xca   : > { %959 = vmatpush1.msra.mxu1 %v1413_v1  ;;  %869 = vmatprep.subr.mxu0 %v1780_v31 }
  0xcb   : > { %961 = vmatprep.subr.mxu1 %v1413_v1  ;;  %872 = vmatpush1.msra.mxu0 %v1783_v14 }
  0xcc   : > { %963 = vmatpush1.msra.mxu1 %v1413_v1  ;;  %875 = vmatprep.subr.mxu0 %v1800_v44 }
  0xcd   : > { %965 = vmatprep.subr.mxu1 %v1643_v6  ;;  %878 = vmatpush1.msra.mxu0 %v1803_v45 }
  0xce   : > { %967 = vmatpush1.msra.mxu1 %v1645_v7  ;;  %914 = vmatmul.mubr.f32.vlgmr.msra.gmra.mxu0 %v1716_v43 }
  0xcf   : > { %969 = vmatprep.subr.mxu1 %v1718_v48  ;;  %1029 = vmatprep.subr.mxu0 %v1413_v1 }
  0xd0   : > { %971 = vmatpush1.msra.mxu1 %v1728_v51  ;;  %1033 = vmatpush1.msra.mxu0 %v1413_v1 }
  0xd1   : > { %973 = vmatprep.subr.mxu1 %v1711_v41  ;;  %1037 = vmatprep.subr.mxu0 %v1413_v1 }
  0xd2   : > { %975 = vmatpush1.msra.mxu1 %v1713_v42  ;;  %1041 = vmatpush1.msra.mxu0 %v1413_v1 }
  0xd3   : > { %977 = vmatprep.subr.mxu1 %v1774_v29  ;;  %1045 = vmatprep.subr.mxu0 %v1413_v1 }
  0xd4   : > { %979 = vmatpush1.msra.mxu1 %v1776_v30  ;;  %1049 = vmatpush1.msra.mxu0 %v1413_v1 }
  0xd5   : > { %981 = vmatprep.subr.mxu1 %v1786_v35  ;;  %1053 = vmatprep.subr.mxu0 %v1413_v1 }
  0xd6   : > { %983 = vmatpush1.msra.mxu1 %v1788_v36  ;;  %1016 = vmatprep.mubr.f32.mxu1 %v1413_v1 }
  0xd7   : > { %1057 = vmatpush1.msra.mxu0 %v1413_v1  ;;  %1020 = vmatmul.mubr.f32.vlgmr.msra.gmra.mxu1 %v542_v12 }
  0xd8   : > { %1061 = vmatprep.subr.mxu0 %v1413_v1  ;;  %1195 = vmatprep.subr.mxu1 %v1413_v1 }
  0xd9   : > { %1065 = vmatpush1.msra.mxu0 %v1413_v1  ;;  %1197 = vmatpush1.msra.mxu1 %v1413_v1 }
  0xda   : > { %1069 = vmatprep.subr.mxu0 %v1413_v1  ;;  %1199 = vmatprep.subr.mxu1 %v1413_v1 }
  0xdb   : > { %1073 = vmatpush1.msra.mxu0 %v1413_v1  ;;  %1201 = vmatpush1.msra.mxu1 %v1413_v1 }
  0xdc   : > { %1077 = vmatprep.subr.mxu0 %v1413_v1  ;;  %1203 = vmatprep.subr.mxu1 %v1413_v1 }
  0xdd   : > { %1081 = vmatpush1.msra.mxu0 %v1413_v1  ;;  %1205 = vmatpush1.msra.mxu1 %v1413_v1 }
  0xde   : > { %1085 = vmatprep.subr.mxu0 %v1413_v1  ;;  %1207 = vmatprep.subr.mxu1 %v1413_v1 }
  0xdf   : > { %1089 = vmatpush1.msra.mxu0 %v1413_v1  ;;  %1209 = vmatpush1.msra.mxu1 %v1413_v1 }
  0xe0   : > { %1093 = vmatprep.subr.mxu0 %v1413_v1  ;;  %1211 = vmatprep.subr.mxu1 %v1413_v1 }
  0xe1   : > { %1097 = vmatpush1.msra.mxu0 %v1413_v1  ;;  %1213 = vmatpush1.msra.mxu1 %v1413_v1 }
  0xe2   : > { %1101 = vmatprep.subr.mxu0 %v1413_v1  ;;  %1215 = vmatprep.subr.mxu1 %v1413_v1 }
  0xe3   : > { %1105 = vmatpush1.msra.mxu0 %v1413_v1  ;;  %1217 = vmatpush1.msra.mxu1 %v1413_v1 }
  0xe4   : > { %1109 = vmatprep.subr.mxu0 %v1413_v1  ;;  %1219 = vmatprep.subr.mxu1 %v1413_v1 }
  0xe5   : > { %1113 = vmatpush1.msra.mxu0 %v1413_v1  ;;  %1221 = vmatpush1.msra.mxu1 %v1413_v1 }
  0xe6   : > { %1117 = vmatprep.subr.mxu0 %v685_v27  ;;  %1223 = vmatprep.subr.mxu1 %v1413_v1 }
  0xe7   : > { %1121 = vmatpush1.msra.mxu0 %v691_v28  ;;  %1225 = vmatpush1.msra.mxu1 %v1413_v1 }
  0xe8   : > { %1125 = vmatprep.subr.mxu0 %v697_v62  ;;  %1227 = vmatprep.subr.mxu1 %v1413_v1 }
  0xe9   : > { %1129 = vmatpush1.msra.mxu0 %v703_v2  ;;  %1229 = vmatpush1.msra.mxu1 %v1413_v1 }
  0xea   : > { %1133 = vmatprep.subr.mxu0 %v709_v3  ;;  %1231 = vmatprep.subr.mxu1 %v1413_v1 }
  0xeb   : > { %1137 = vmatpush1.msra.mxu0 %v715_v10  ;;  %1233 = vmatpush1.msra.mxu1 %v1413_v1 }
  0xec   : > { %1141 = vmatprep.subr.mxu0 %v721_v37  ;;  %1235 = vmatprep.subr.mxu1 %v1413_v1 }
  0xed   : > { %1145 = vmatpush1.msra.mxu0 %v727_v38  ;;  %1237 = vmatpush1.msra.mxu1 %v1413_v1 }
  0xee   : > { %1149 = vmatprep.subr.mxu0 %v733_v20  ;;  %1239 = vmatprep.subr.mxu1 %v1643_v6 }
  0xef   : > { %1153 = vmatpush1.msra.mxu0 %v739_v49  ;;  %1186 = vmatprep.mubr.f32.mxu0 %v1413_v1 }
  0xf0   : > { %1241 = vmatpush1.msra.mxu1 %v1645_v7  ;;  %1188 = vmatmul.mubr.f32.vlgmr.msra.gmra.mxu0 %v1680_v21 }
  0xf1   : > { %1243 = vmatprep.subr.mxu1 %v1718_v48  ;;  %1290 = vmatprep.mubr.f32.mxu1 %v1413_v1 }
  0xf2   : > { %1245 = vmatpush1.msra.mxu1 %v1728_v51 }
  0xf3   : > { %1247 = vmatprep.subr.mxu1 %v1711_v41 }
  0xf4   : > { %1249 = vmatpush1.msra.mxu1 %v1713_v42 }
  0xf5   : > { %1251 = vmatprep.subr.mxu1 %v1774_v29 }
  0xf6   : > { %1253 = vmatpush1.msra.mxu1 %v1776_v30 }
  0xf7   : > { %1255 = vmatprep.subr.mxu1 %v1786_v35 }
  0xf8   : > { %1257 = vmatpush1.msra.mxu1 %v1788_v36 }
  0xf9   : > { %1292 = vmatmul.mubr.f32.vlgmr.msra.gmra.mxu1 %v1680_v21 }
 0x16e   : > { %v546_v6 = vpop.f32.mrf.mxu0 }
 0x170   : > { %v548_v7 = vpop.f32.mrf.mxu0 }
 0x176   : > { %v778_v1 = vpop.f32.mrf.mxu1 }
 0x177   : > { %v779_v41 = vadd.f32 %v778_v1, %v546_v6 }
 0x178   : > { %v780_v18 = vpop.f32.mrf.mxu1 }
 0x179   : > { %v781_v43 = vadd.f32 %v780_v18, %v548_v7 }
 0x18e   : > { %v915_v17 = vpop.f32.mrf.mxu0 }
 0x18f   : > { %v916_v48 = vadd.f32 %v915_v17, %v779_v41 }
 0x190   : > { %v917_v27 = vpop.f32.mrf.mxu0 }
 0x191   : > { %v918_v22 = vadd.f32 %v917_v27, %v781_v43 }
 0x197   : > { %v1021_v28 = vpop.f32.mrf.mxu1 }
 0x198   : > { %v1022_v55 = vadd.f32 %v1021_v28, %v916_v48 }
 0x199   : > { %v1023_v51 = vpop.f32.mrf.mxu1 }
 0x19a   : > { %v1024_v57 = vadd.f32 %v1023_v51, %v918_v22 }
 0x1b0   : > { %v1189_v42 = vpop.f32.mrf.mxu0 }
 0x1b1   : > { %v1190_v58 = vadd.f32 %v1189_v42, %v1022_v55 }
 0x1b2   : > { %v1191_v56 = vpop.f32.mrf.mxu0 }
 0x1b3   : > { %v1192_v59 = vadd.f32 %v1191_v56, %v1024_v57 }
 0x1b9   : > { %v1293_v21 = vpop.f32.mrf.mxu1 }
 0x1ba   : > { %v1294_v60 = vadd.f32 %v1293_v21, %v1190_v58 }
 0x1bb   : > { %v1295_v61 = vpop.f32.mrf.mxu1 }
 0x1bc   : > { %v1298_v62 = vmax.f32 %v1294_v60, 0.0  ;;  %v1296_v63 = vadd.f32 %v1295_v61, %v1192_v59 }
 0x1be   : > { %1300 = vst [vmem:[%s143_s29] sm:$0xff] %v1298_v62  ;;  %v1299_v0 = vmax.f32 %v1296_v63, 0.0 }
 0x1c0   : > { %1301 = vst [vmem:[%s143_s29 + $0x8] sm:$0xff] %v1299_v0 }
 0x1c1 PF: > { %s12_s9 = sadd.s32 1, %s1411_s9  }
 0x1c2   : > { %p9_p4 = scmp.ge.s32.totalorder %s12_s9, 4  }
 0x1c4   :  { %11 = sbr.rel (!%p9_p4) target bundleno = 1 (0x1), region = 59 }

</bundles_post_ra>
